<compile_context>
chip_gen: v7x
topology: tpu7x:2x2x1
jax: 0.10.0
libtpu: 0.0.40
codegen_flags: <defaults>
</compile_context>

<pallas_src>
import functools

import jax
import jax.numpy as jnp
from jax.experimental import pallas as pl
from jax.experimental.pallas import tpu as pltpu

LANE = 128
MAX_WIDTH = 8192                    # widest lane-dense slab we form (64 vregs wide)
VMEM_LIMIT_BYTES = 48 * 1024 * 1024
MIN_GRID_STEPS = 4                  # keep a few steps for pipelining / v7x sharding


def _ceil_to(a, b):
    return -(-a // b) * b


def _cdiv(a, b):
    return -(-a // b)


def _pick_width(n, max_width):
    """Largest multiple-of-128 divisor of n (n already a multiple of 128), <= max_width."""
    base = n // LANE
    w = min(max_width // LANE, base)
    while w > 1:
        if base % w == 0:
            return w * LANE
        w -= 1
    return LANE


def _sublane_min(itemsize):
    # Minimum sublane tile per dtype width: (8,128) f32, (16,128) bf16, (32,128) 8-bit.
    return {4: 8, 2: 16, 1: 32}.get(itemsize, 8)


def _device_kind():
    try:
        return jax.devices()[0].device_kind.lower()
    except Exception:
        return ""


def _dice_kernel(alpha_ref, x_ref, o_ref, *, compute_dtype):
    """alpha_ref: SMEM (1,) scalar param; x_ref/o_ref: VMEM (row_tile, width) tiles."""
    x = x_ref[...].astype(compute_dtype)
    alpha = alpha_ref[0].astype(compute_dtype)      # scalar, once per tile
    sig = jax.nn.sigmoid(x)                         # EUP exp + reciprocal path
    o_ref[...] = (x * (alpha + (1 - alpha) * sig)).astype(o_ref.dtype)


def dice_forward(x, alpha, *, target_block_bytes=None):
    """Apply Dice activation elementwise to x of any shape / any size."""
    orig_shape = x.shape
    dtype = x.dtype
    total = int(x.size)
    itemsize = jnp.dtype(dtype).itemsize
    kind = _device_kind()

    # Chip-aware block sizing: ~2 MiB on v5e, ~4 MiB elsewhere (v6e/v7x).
    if target_block_bytes is None:
        target_block_bytes = (2 if "v5" in kind else 4) * 1024 * 1024

    # In-kernel compute dtype: f32 for f32 inputs; low-precision floats stay
    # in their own dtype on v6e/v7x; f32 upcast kept on v5e (no bf16 VPU/EUP).
    if dtype == jnp.float32:
        compute_dtype = jnp.float32
    elif dtype in (jnp.bfloat16, jnp.float16):
        compute_dtype = jnp.float32 if "v5" in kind else dtype
    else:
        compute_dtype = jnp.float32

    # ---- lane-dense 2-D slab (rows, width); avoid padding whenever possible ----
    padded_total = total if total % LANE == 0 else _ceil_to(total, LANE)
    width = _pick_width(padded_total, MAX_WIDTH)
    rows = padded_total // width

    if padded_total == total:
        x2 = x.reshape(rows, width)                 # no pad, no extra HBM pass
    else:
        # Odd-sized inputs only: pad the sub-lane tail to the next 128 multiple.
        flat = jnp.ravel(x)
        x2 = jnp.pad(flat, (0, padded_total - total)).reshape(rows, width)

    # ---- row tile: ~target_block_bytes, dtype-aware sublane rounding ----
    sub = _sublane_min(itemsize)
    if rows <= sub:
        row_tile = rows                             # full row extent (single block)
    else:
        target_rows = max(sub, target_block_bytes // (width * itemsize))
        row_tile = min(_ceil_to(rows, sub), _ceil_to(target_rows, sub))
        # Keep a handful of grid steps when the array is big enough, so the
        # pipeline overlaps DMA/compute and the axis can shard across 2 TCs.
        if rows >= MIN_GRID_STEPS * sub:
            row_tile = min(row_tile,
                           max(sub, _ceil_to(_cdiv(rows, MIN_GRID_STEPS), sub)))

    grid = (_cdiv(rows, row_tile),)                 # ragged last block masked by Pallas

    cost = pl.CostEstimate(
        flops=4 * padded_total,
        transcendentals=padded_total,
        bytes_accessed=2 * padded_total * itemsize,
    )

    out2 = pl.pallas_call(
        functools.partial(_dice_kernel, compute_dtype=compute_dtype),
        out_shape=jax.ShapeDtypeStruct((rows, width), dtype),
        grid=grid,
        in_specs=[
            # scalar parameter alpha lives in SMEM, whole array, no tiling
            pl.BlockSpec(memory_space=pltpu.MemorySpace.SMEM),
            # x tiled over rows, full-width lane-dense last dim
            pl.BlockSpec((row_tile, width), lambda i: (i, 0)),
        ],
        out_specs=pl.BlockSpec((row_tile, width), lambda i: (i, 0)),
        compiler_params=pltpu.CompilerParams(
            # TODO(synk): on v7x use pltpu.CORE_PARALLEL (or a core_map) to
            # guarantee 2-TensorCore sharding; "parallel" is the portable choice.
            dimension_semantics=("parallel",),
            vmem_limit_bytes=VMEM_LIMIT_BYTES,
        ),
        cost_estimate=cost,
    )(alpha, x2)

    if padded_total == total:
        return out2.reshape(orig_shape)
    return out2.reshape(-1)[:total].reshape(orig_shape)


if __name__ == "__main__":
    key = jax.random.PRNGKey(0)

    # Input in NCHW, matching the PyTorch convention: (N=2, C=4, H=16, W=16)
    x = jax.random.normal(key, (2, 4, 16, 16), dtype=jnp.float32)

    # Parameter shape from Dice.__init__: nn.Parameter(torch.zeros(1)).
    # PyTorch initializes alpha to 0; use a deterministic nonzero value so the
    # alpha branch of the computation is actually exercised.
    alpha = jnp.array([0.25], dtype=jnp.float32)

    out = dice_forward(x, alpha)
    out = jax.block_until_ready(out)

    # Reference check in plain JAX (same math as the PyTorch forward).
    sig = jax.nn.sigmoid(x)
    ref = alpha[0] * (1.0 - sig) * x + sig * x
    assert out.shape == x.shape and out.dtype == x.dtype
    assert jnp.allclose(out, ref, atol=1e-6, rtol=1e-6), "mismatch vs reference"

    print("KERNEL_OK")
</pallas_src>

<mosaic_0001>
module attributes {stable_mosaic.version = 11 : i64} {
  func.func @_dice_kernel(%arg0: i32, %arg1: memref<1xf32, #tpu.memory_space<smem>>, %arg2: memref<1x2048xf32, #tpu.memory_space<vmem>>, %arg3: memref<1x2048xf32, #tpu.memory_space<vmem>>) attributes {dimension_semantics = [#tpu.dimension_semantics<parallel>], iteration_bounds = array<i64: 1>, scalar_prefetch = 0 : i64, scratch_operands = 0 : i64, tpu.core_type = #tpu.core_type<tc>, window_params = [{transform_indices = @transform_0, window_bounds = array<i64: 1>}, {transform_indices = @transform_1, window_bounds = array<i64: 1, 2048>}, {transform_indices = @transform_2, window_bounds = array<i64: 1, 2048>}]} {
    %c0 = arith.constant 0 : index
    %c0_0 = arith.constant 0 : index
    %0 = vector.load %arg2[%c0, %c0_0] : memref<1x2048xf32, #tpu.memory_space<vmem>>, vector<1x2048xf32>
    %c0_1 = arith.constant 0 : index
    %1 = memref.load %arg1[%c0_1] : memref<1xf32, #tpu.memory_space<smem>>
    %2 = arith.negf %0 : vector<1x2048xf32>
    %3 = math.exp %2 : vector<1x2048xf32>
    %cst = arith.constant 1.000000e+00 : f32
    %4 = vector.broadcast %cst : f32 to vector<1x2048xf32>
    %5 = arith.addf %4, %3 : vector<1x2048xf32>
    %6 = arith.divf %4, %5 : vector<1x2048xf32>
    %cst_2 = arith.constant 1.000000e+00 : f32
    %7 = arith.subf %cst_2, %1 : f32
    %8 = vector.broadcast %7 : f32 to vector<1x2048xf32>
    %9 = arith.mulf %8, %6 : vector<1x2048xf32>
    %10 = vector.broadcast %1 : f32 to vector<1x2048xf32>
    %11 = arith.addf %10, %9 : vector<1x2048xf32>
    %12 = arith.mulf %0, %11 : vector<1x2048xf32>
    %c0_3 = arith.constant 0 : index
    %c0_4 = arith.constant 0 : index
    %13 = vector.load %arg3[%c0_3, %c0_4] : memref<1x2048xf32, #tpu.memory_space<vmem>>, vector<1x2048xf32>
    tpu.vector_store %arg3[%c0_3, %c0_4], %12 {strides = array<i32>} : memref<1x2048xf32, #tpu.memory_space<vmem>>, vector<1x2048xf32>,
    return
  }
  func.func @transform_0(%arg0: i32) -> i32 {
    %c0_i32 = arith.constant 0 : i32
    %c0_i32_0 = arith.constant 0 : i32
    return %c0_i32 : i32
  }
  func.func @transform_1(%arg0: i32) -> (i32, i32) {
    %c0_i32 = arith.constant 0 : i32
    %c0_i32_0 = arith.constant 0 : i32
    return %arg0, %c0_i32 : i32, i32
  }
  func.func @transform_2(%arg0: i32) -> (i32, i32) {
    %c0_i32 = arith.constant 0 : i32
    %c0_i32_0 = arith.constant 0 : i32
    return %arg0, %c0_i32 : i32, i32
  }
}

</mosaic_0001>

<bundles_post_ra>
// kernel: tpu_custom_call.1
= control target key start
LH: loop header
LB: loop body
LE: loop exit
PB: predicated region body
PF: predicated region fallthrough
CT: control target
= control target key end

     0   :  { %8 = vsyncpa [#allocation4], 0  ;;  %s173_s0 = inlined_call_operand.<no memory space> [shape: f32[1], index: 0, kind: input, shape index: {}]   ;;  %s174_s1 = inlined_call_operand.hbm [shape: f32[1,2048], index: 1, kind: input, shape index: {}]   ;;  %s175_s2 = inlined_call_operand.hbm [shape: f32[1,2048], index: 2, kind: output, shape index: {}]  }
   0x1   :  { %9 = vsyncpa [#allocation5], 0  ;;  %s126_s9 = smov [#allocation3]   ;;  %s78_s13 = scalar_lea.hbm %s174_s1, 256 }
   0x2   :  { %s18_s10 = sshll.u32 %s126_s9, 4  ;;  %p79_p0 = scmp.ne.s32.totalorder %s174_s1, %s78_s13  ;;  %s19_s10 = int_to_ptr.vmem [resolvable:$true] %s18_s10 }
   0x3   :  { %p82_p1 = scmp.lt.u32.totalorder %s78_s13, %s174_s1 }
   0x5   :  { %p84_p2 = pnand %p82_p1, %p79_p0 }
   0x7   :  { %87 = shalt.err (!%p84_p2)
}
   0x8   :  { %s88_s18 = scalar_lea.vmem %s19_s10, 256  ;;  %p93_p4 = scmp.lt.s32.totalorder %s19_s10, %s19_s10 }
   0x9   :  { %p89_p3 = scmp.ne.s32.totalorder %s19_s10, %s88_s18  ;;  %p94_p5 = scmp.lt.s32.totalorder %s88_s18, %s88_s18 }
   0xb   :  { %p95_p6 = por %p94_p5, %p93_p4 }
   0xd   :  { %p96_p7 = pnand %p95_p6, %p89_p3 }
   0xf   :  { %99 = shalt.err (!%p96_p7)
}
  0x10   :  { %21 = dma.hbm_to_vmem [thread:$0]  %s174_s1, 256, %s19_s10, [#allocation4]  }
  0x11   :  { %122 = dma.done.wait [#allocation4], 256  }
  0x12   :  { %123 = vsyncadd [#allocation4], 4294967040  ;;  %v25_v0 = vld [vmem:[#allocation3] sm:$0xff]  ;;  %v26_v1 = vld [vmem:[#allocation3 + $0x8] sm:$0xff]  ;;  %s40_s23 = ssub.f32 1.0, %s173_s0  ;;  %v44_v10 = vstv %s173_s0  ;;  %s127_s25 = smov [#allocation6]  }
  0x13   :  { %v66_v2 = vmul.f32 -1.442695, %v25_v0  ;;  %v67_v3 = vmul.f32 -1.442695, %v26_v1  ;;  %s57_s26 = sshll.u32 %s127_s25, 4  ;;  %s58_s26 = int_to_ptr.vmem [resolvable:$true] %s57_s26 }
  0x14   :  { %v41_v8 = vstv %s40_s23  ;;  %s100_s27 = scalar_lea.vmem %s58_s26, 256  ;;  %p105_p9 = scmp.lt.s32.totalorder %s58_s26, %s58_s26 }
  0x15   :  { %70 = vpow2.f32 %v66_v2  ;;  %p101_p8 = scmp.ne.s32.totalorder %s58_s26, %s100_s27  ;;  %p106_p10 = scmp.lt.s32.totalorder %s100_s27, %s100_s27 }
  0x16   :  { %72 = vpow2.f32 %v67_v3 }
  0x17   :  { %p107_p11 = por %p106_p10, %p105_p9 }
  0x19   :  { %p108_p12 = pnand %p107_p11, %p101_p8 }
  0x1f   :  { %v71_v4 = vpop.eup %70 }
  0x20   :  { %v73_v5 = vpop.eup %72  ;;  %v34_v6 = vadd.f32 1.0, %v71_v4 }
  0x21   :  { %v35_v7 = vadd.f32 1.0, %v73_v5 }
  0x22   :  { %74 = vrcp.f32 %v34_v6 }
  0x23   :  { %76 = vrcp.f32 %v35_v7 }
  0x2c   :  { %v75_v9 = vpop.eup %74 }
  0x2d   :  { %v77_v11 = vpop.eup %76  ;;  %v42_v12 = vmul.f32 %v75_v9, %v41_v8 }
  0x2e   :  { %v43_v13 = vmul.f32 %v77_v11, %v41_v8 }
  0x2f   :  { %v45_v14 = vadd.f32 %v44_v10, %v42_v12 }
  0x30   :  { %v46_v15 = vadd.f32 %v44_v10, %v43_v13 }
  0x31   :  { %v47_v16 = vmul.f32 %v45_v14, %v25_v0 }
  0x32   :  { %v48_v17 = vmul.f32 %v46_v15, %v26_v1 }
  0x33   :  { %49 = vst [vmem:[#allocation6] sm:$0xff] %v47_v16 }
  0x34   :  { %50 = vst [vmem:[#allocation6 + $0x8] sm:$0xff] %v48_v17 }
  0x35   :  { %111 = shalt.err (!%p108_p12)
}
  0x36   :  { %s112_s29 = scalar_lea.hbm %s175_s2, 256 }
  0x37   :  { %p113_p13 = scmp.ne.s32.totalorder %s175_s2, %s112_s29  ;;  %p116_p0 = scmp.lt.u32.totalorder %s112_s29, %s175_s2 }
  0x39   :  { %p118_p1 = pnand %p116_p0, %p113_p13 }
  0x3b   :  { %121 = shalt.err (!%p118_p1)
}
  0x3c   :  { %60 = dma.vmem_to_hbm [thread:$0]  %s58_s26, 256, %s175_s2, [#allocation5]  }
  0x3d   :  { %124 = dma.done.wait [#allocation5], 256  }
  0x3e   :  { %125 = vsyncadd [#allocation5], 4294967040 }
  0x3f   :  { %64 = vsyncpa [#allocation4], 1 }
  0x40   :  { %65 = vsyncpa [#allocation5], 1 }

</bundles_post_ra>
